<compile_context>
chip_gen: v7x
topology: tpu7x:2x2x1
jax: 0.10.0
libtpu: 0.0.40
codegen_flags: <defaults>
</compile_context>

<pallas_src>
import functools
import math

import jax
import jax.numpy as jnp
from jax import lax
from jax.experimental import pallas as pl
from jax.experimental.pallas import tpu as pltpu


VMEM_LIMIT = 32 * 1024 * 1024  # safe on v5e/v6e/v7x


def _tile(dim, target):
    """Largest usable tile: `target` if it divides `dim`, else the full dim."""
    if dim <= target or dim % target != 0:
        return dim
    return target


def _cparams(dims):
    return pltpu.CompilerParams(dimension_semantics=dims,
                                vmem_limit_bytes=VMEM_LIMIT)


# ---------------------------------------------------------------------------
# Kernels
# ---------------------------------------------------------------------------

def linear_bias_kernel(x_ref, w_ref, b_ref, o_ref, acc_ref):
    """Tiled o = x @ w + b with f32 accumulation. grid = (Mt, Nt, Kt)."""
    k = pl.program_id(2)

    @pl.when(k == 0)
    def _():
        acc_ref[...] = jnp.zeros_like(acc_ref)

    acc_ref[...] += jnp.dot(x_ref[...], w_ref[...],
                            preferred_element_type=jnp.float32)

    @pl.when(k == pl.num_programs(2) - 1)
    def _():
        o_ref[...] = (acc_ref[...] + b_ref[...].astype(jnp.float32)).astype(o_ref.dtype)


def proj_res_ln_kernel(x_ref, w_ref, b_ref, res_ref, g_ref, be_ref,
                       o_ref, acc_ref, *, eps):
    """Fused o = LayerNorm(x @ w + b + residual). grid = (Mt, Kt)."""
    k = pl.program_id(1)

    @pl.when(k == 0)
    def _():
        acc_ref[...] = jnp.zeros_like(acc_ref)

    acc_ref[...] += jnp.dot(x_ref[...], w_ref[...],
                            preferred_element_type=jnp.float32)

    @pl.when(k == pl.num_programs(1) - 1)
    def _():
        y = acc_ref[...] + b_ref[...].astype(jnp.float32) + res_ref[...].astype(jnp.float32)
        mu = jnp.mean(y, axis=-1, keepdims=True)
        var = jnp.mean(jnp.square(y - mu), axis=-1, keepdims=True)
        yn = (y - mu) * lax.rsqrt(var + eps)
        o_ref[...] = (yn * g_ref[...].astype(jnp.float32)
                      + be_ref[...].astype(jnp.float32)).astype(o_ref.dtype)


def ffn_res_ln_kernel(x_ref, w1_ref, b1_ref, w2_ref, b2_ref, g_ref, be_ref,
                      o_ref, acc_ref, *, eps):
    """Fused PositionwiseFeedForward: LayerNorm(relu(x@w1+b1)@w2 + b2 + x).

    grid = (Mt, Ft): d_ff is a tiled reduction axis, the (M, d_ff) intermediate
    never exists outside a (tm, tf) block.
    """
    f = pl.program_id(1)

    @pl.when(f == 0)
    def _():
        acc_ref[...] = jnp.zeros_like(acc_ref)

    h = jnp.dot(x_ref[...], w1_ref[...], preferred_element_type=jnp.float32)
    h = h + b1_ref[...].astype(jnp.float32)
    h = jnp.maximum(h, 0.0).astype(x_ref.dtype)        # bf16 back onto the MXU
    acc_ref[...] += jnp.dot(h, w2_ref[...], preferred_element_type=jnp.float32)

    @pl.when(f == pl.num_programs(1) - 1)
    def _():
        y = acc_ref[...] + b2_ref[...].astype(jnp.float32) + x_ref[...].astype(jnp.float32)
        mu = jnp.mean(y, axis=-1, keepdims=True)
        var = jnp.mean(jnp.square(y - mu), axis=-1, keepdims=True)
        yn = (y - mu) * lax.rsqrt(var + eps)
        o_ref[...] = (yn * g_ref[...].astype(jnp.float32)
                      + be_ref[...].astype(jnp.float32)).astype(o_ref.dtype)


def _mha_core(q_all, k_all, v_all, H, d_k, d_v, scale):
    """q_all:(Lq,H*dk) k_all:(Lk,H*dk) v_all:(Lk,H*dv) -> (H,Lq,Lk) f32, (Lq,H*dv) f32."""
    attn_heads, ctx_heads = [], []
    for h in range(H):
        q = q_all[:, h * d_k:(h + 1) * d_k]
        k = k_all[:, h * d_k:(h + 1) * d_k]
        v = v_all[:, h * d_v:(h + 1) * d_v]
        # contract d_k directly -- no materialized k.T
        s = lax.dot_general(q, k, (((1,), (1,)), ((), ())),
                            preferred_element_type=jnp.float32) * scale
        m = jnp.max(s, axis=-1, keepdims=True)
        e = jnp.exp(s - m)
        denom = jnp.sum(e, axis=-1, keepdims=True)
        p = e * pl.reciprocal(denom, approx=True)       # EUP slot, ~free
        ctx = jnp.dot(p.astype(v.dtype), v, preferred_element_type=jnp.float32)
        attn_heads.append(p)
        ctx_heads.append(ctx)
    attn = jnp.stack(attn_heads, axis=0)                # (H, Lq, Lk)
    ctx = jnp.concatenate(ctx_heads, axis=-1)           # (Lq, H*dv)  lane-dense
    return attn, ctx


def self_attn_kernel(qkv_ref, attn_ref, ctx_ref, *, H, d_k, d_v, scale):
    """Packed self-attention for one batch: qkv:(1,L,H*(2dk+dv))."""
    qkv = qkv_ref[0]
    q = qkv[:, : H * d_k]
    k = qkv[:, H * d_k: 2 * H * d_k]
    v = qkv[:, 2 * H * d_k:]
    attn, ctx = _mha_core(q, k, v, H, d_k, d_v, scale)
    attn_ref[0] = attn
    ctx_ref[0] = ctx.astype(ctx_ref.dtype)


def cross_attn_kernel(q_ref, kv_ref, attn_ref, ctx_ref, *, H, d_k, d_v, scale):
    """Encoder-decoder attention: q:(1,Lq,H*dk), kv:(1,Lk,H*(dk+dv))."""
    q = q_ref[0]
    kv = kv_ref[0]
    k = kv[:, : H * d_k]
    v = kv[:, H * d_k:]
    attn, ctx = _mha_core(q, k, v, H, d_k, d_v, scale)
    attn_ref[0] = attn
    ctx_ref[0] = ctx.astype(ctx_ref.dtype)


# ---------------------------------------------------------------------------
# pallas_call wrappers
# ---------------------------------------------------------------------------

def run_linear(x, w, b, out_dtype):
    M, K = x.shape
    _, N = w.shape
    tm, tn, tk = _tile(M, 256), _tile(N, 256), _tile(K, 512)
    return pl.pallas_call(
        linear_bias_kernel,
        out_shape=jax.ShapeDtypeStruct((M, N), out_dtype),
        grid=(M // tm, N // tn, K // tk),
        in_specs=[
            pl.BlockSpec((tm, tk), lambda i, j, k: (i, k)),
            pl.BlockSpec((tk, tn), lambda i, j, k: (k, j)),
            pl.BlockSpec((1, tn), lambda i, j, k: (0, j)),
        ],
        out_specs=pl.BlockSpec((tm, tn), lambda i, j, k: (i, j)),
        scratch_shapes=[pltpu.VMEM((tm, tn), jnp.float32)],
        compiler_params=_cparams(("parallel", "parallel", "arbitrary")),
    )(x, w, b)


def run_proj_residual_ln(x, w, b, res, gamma, beta, out_dtype, eps=1e-6):
    M, K = x.shape
    _, D = w.shape
    tm, tk = _tile(M, 256), _tile(K, 256)
    kernel = functools.partial(proj_res_ln_kernel, eps=eps)
    return pl.pallas_call(
        kernel,
        out_shape=jax.ShapeDtypeStruct((M, D), out_dtype),
        grid=(M // tm, K // tk),
        in_specs=[
            pl.BlockSpec((tm, tk), lambda i, k: (i, k)),
            pl.BlockSpec((tk, D), lambda i, k: (k, 0)),
            pl.BlockSpec((1, D), lambda i, k: (0, 0)),
            pl.BlockSpec((tm, D), lambda i, k: (i, 0)),
            pl.BlockSpec((1, D), lambda i, k: (0, 0)),
            pl.BlockSpec((1, D), lambda i, k: (0, 0)),
        ],
        out_specs=pl.BlockSpec((tm, D), lambda i, k: (i, 0)),
        scratch_shapes=[pltpu.VMEM((tm, D), jnp.float32)],
        compiler_params=_cparams(("parallel", "arbitrary")),
    )(x, w, b, res, gamma, beta)


def run_ffn_residual_ln(x, w1, b1, w2, b2, gamma, beta, out_dtype, eps=1e-6):
    M, D = x.shape
    _, F = w1.shape
    tm, tf = _tile(M, 256), _tile(F, 512)
    kernel = functools.partial(ffn_res_ln_kernel, eps=eps)
    return pl.pallas_call(
        kernel,
        out_shape=jax.ShapeDtypeStruct((M, D), out_dtype),
        grid=(M // tm, F // tf),
        in_specs=[
            pl.BlockSpec((tm, D), lambda i, f: (i, 0)),
            pl.BlockSpec((D, tf), lambda i, f: (0, f)),
            pl.BlockSpec((1, tf), lambda i, f: (0, f)),
            pl.BlockSpec((tf, D), lambda i, f: (f, 0)),
            pl.BlockSpec((1, D), lambda i, f: (0, 0)),
            pl.BlockSpec((1, D), lambda i, f: (0, 0)),
            pl.BlockSpec((1, D), lambda i, f: (0, 0)),
        ],
        out_specs=pl.BlockSpec((tm, D), lambda i, f: (i, 0)),
        scratch_shapes=[pltpu.VMEM((tm, D), jnp.float32)],
        compiler_params=_cparams(("parallel", "arbitrary")),
    )(x, w1, b1, w2, b2, gamma, beta)


def run_self_attention(qkv, H, d_k, d_v, scale):
    B, L, N = qkv.shape
    kernel = functools.partial(self_attn_kernel, H=H, d_k=d_k, d_v=d_v, scale=scale)
    attn, ctx = pl.pallas_call(
        kernel,
        out_shape=(
            jax.ShapeDtypeStruct((B, H, L, L), jnp.float32),
            jax.ShapeDtypeStruct((B, L, H * d_v), jnp.bfloat16),
        ),
        grid=(B,),
        in_specs=[pl.BlockSpec((1, L, N), lambda b: (b, 0, 0))],
        out_specs=(
            pl.BlockSpec((1, H, L, L), lambda b: (b, 0, 0, 0)),
            pl.BlockSpec((1, L, H * d_v), lambda b: (b, 0, 0)),
        ),
        compiler_params=_cparams(("parallel",)),
    )(qkv)
    return attn, ctx


def run_cross_attention(q, kv, H, d_k, d_v, scale):
    B, Lq, Nq = q.shape
    _, Lk, Nkv = kv.shape
    kernel = functools.partial(cross_attn_kernel, H=H, d_k=d_k, d_v=d_v, scale=scale)
    attn, ctx = pl.pallas_call(
        kernel,
        out_shape=(
            jax.ShapeDtypeStruct((B, H, Lq, Lk), jnp.float32),
            jax.ShapeDtypeStruct((B, Lq, H * d_v), jnp.bfloat16),
        ),
        grid=(B,),
        in_specs=[
            pl.BlockSpec((1, Lq, Nq), lambda b: (b, 0, 0)),
            pl.BlockSpec((1, Lk, Nkv), lambda b: (b, 0, 0)),
        ],
        out_specs=(
            pl.BlockSpec((1, H, Lq, Lk), lambda b: (b, 0, 0, 0)),
            pl.BlockSpec((1, Lq, H * d_v), lambda b: (b, 0, 0)),
        ),
        compiler_params=_cparams(("parallel",)),
    )(q, kv)
    return attn, ctx


# ---------------------------------------------------------------------------
# Parameters & DecoderLayer forward
# ---------------------------------------------------------------------------

def init_params(key, n_heads, d_model, d_k, d_v, d_ff):
    ks = jax.random.split(key, 8)

    def dense(k, din, dout):
        # weights in bf16 (MXU-native, half the HBM traffic); biases/LN in f32
        return (jax.random.normal(k, (din, dout), jnp.float32) / math.sqrt(din)
                ).astype(jnp.bfloat16)

    H = n_heads
    p = {
        # --- masked multi-head self attention (packed [Wq|Wk|Wv]) ---
        "sa_w_qkv": dense(ks[0], d_model, H * (2 * d_k + d_v)),
        "sa_b_qkv": jnp.zeros((1, H * (2 * d_k + d_v)), jnp.float32),
        "sa_w_o": dense(ks[1], H * d_v, d_model),
        "sa_b_o": jnp.zeros((1, d_model), jnp.float32),
        "sa_ln_g": jnp.ones((1, d_model), jnp.float32),
        "sa_ln_b": jnp.zeros((1, d_model), jnp.float32),
        # --- encoder-decoder attention (Q from decoder, packed [Wk|Wv] from encoder) ---
        "ca_w_q": dense(ks[2], d_model, H * d_k),
        "ca_b_q": jnp.zeros((1, H * d_k), jnp.float32),
        "ca_w_kv": dense(ks[3], d_model, H * (d_k + d_v)),
        "ca_b_kv": jnp.zeros((1, H * (d_k + d_v)), jnp.float32),
        "ca_w_o": dense(ks[4], H * d_v, d_model),
        "ca_b_o": jnp.zeros((1, d_model), jnp.float32),
        "ca_ln_g": jnp.ones((1, d_model), jnp.float32),
        "ca_ln_b": jnp.zeros((1, d_model), jnp.float32),
        # --- position-wise feed forward ---
        "ffn_w1": dense(ks[5], d_model, d_ff),
        "ffn_b1": jnp.zeros((1, d_ff), jnp.float32),
        "ffn_w2": dense(ks[6], d_ff, d_model),
        "ffn_b2": jnp.zeros((1, d_model), jnp.float32),
        "ffn_ln_g": jnp.ones((1, d_model), jnp.float32),
        "ffn_ln_b": jnp.zeros((1, d_model), jnp.float32),
    }
    return p


def decoder_layer_forward(params, decoder_input, encoder_output, n_heads, d_k, d_v):
    """decoder_input: (B, Lq, d_model), encoder_output: (B, Lk, d_model)
    -> (output (B, Lq, d_model), dec_msk_attn (B, H, Lq, Lq), dec_enc_attn (B, H, Lq, Lk))
    Dropout is identity (eval), masks are None.
    """
    B, Lq, D = decoder_input.shape
    _, Lk, _ = encoder_output.shape
    H = n_heads
    scale = 1.0 / math.sqrt(d_k)

    x = decoder_input.astype(jnp.bfloat16).reshape(B * Lq, D)
    e = encoder_output.astype(jnp.bfloat16).reshape(B * Lk, D)

    # ---- 1. masked multi-head self attention ----
    qkv = run_linear(x, params["sa_w_qkv"], params["sa_b_qkv"], jnp.bfloat16)
    dec_msk_attn, sa_ctx = run_self_attention(qkv.reshape(B, Lq, -1), H, d_k, d_v, scale)
    out1 = run_proj_residual_ln(sa_ctx.reshape(B * Lq, H * d_v),
                                params["sa_w_o"], params["sa_b_o"],
                                x, params["sa_ln_g"], params["sa_ln_b"], jnp.bfloat16)

    # ---- 2. encoder-decoder attention ----
    q2 = run_linear(out1, params["ca_w_q"], params["ca_b_q"], jnp.bfloat16)
    kv2 = run_linear(e, params["ca_w_kv"], params["ca_b_kv"], jnp.bfloat16)
    dec_enc_attn, ca_ctx = run_cross_attention(q2.reshape(B, Lq, -1),
                                               kv2.reshape(B, Lk, -1),
                                               H, d_k, d_v, scale)
    out2 = run_proj_residual_ln(ca_ctx.reshape(B * Lq, H * d_v),
                                params["ca_w_o"], params["ca_b_o"],
                                out1, params["ca_ln_g"], params["ca_ln_b"], jnp.bfloat16)

    # ---- 3. position-wise feed forward ----
    out3 = run_ffn_residual_ln(out2, params["ffn_w1"], params["ffn_b1"],
                               params["ffn_w2"], params["ffn_b2"],
                               params["ffn_ln_g"], params["ffn_ln_b"], jnp.float32)

    return out3.reshape(B, Lq, D), dec_msk_attn, dec_enc_attn


# ---------------------------------------------------------------------------
# Demo
# ---------------------------------------------------------------------------

if __name__ == "__main__":
    B, Lq, Lk = 2, 8, 8
    n_heads, d_model, d_k, d_v, d_ff = 4, 32, 8, 8, 64

    key = jax.random.PRNGKey(0)
    k_dec, k_enc, k_par = jax.random.split(key, 3)
    decoder_input = jax.random.normal(k_dec, (B, Lq, d_model), dtype=jnp.float32)
    encoder_output = jax.random.normal(k_enc, (B, Lk, d_model), dtype=jnp.float32)
    params = init_params(k_par, n_heads, d_model, d_k, d_v, d_ff)

    out, dec_attn, dec_enc_attn = decoder_layer_forward(
        params, decoder_input, encoder_output, n_heads, d_k, d_v)
    out = jax.block_until_ready(out)
    dec_attn = jax.block_until_ready(dec_attn)
    dec_enc_attn = jax.block_until_ready(dec_enc_attn)

    assert out.shape == (B, Lq, d_model), out.shape
    assert dec_attn.shape == (B, n_heads, Lq, Lq), dec_attn.shape
    assert dec_enc_attn.shape == (B, n_heads, Lq, Lk), dec_enc_attn.shape
    assert bool(jnp.all(jnp.isfinite(out)))
    assert bool(jnp.all(jnp.isfinite(dec_attn)))
    assert bool(jnp.all(jnp.isfinite(dec_enc_attn)))
    # attention rows sum to ~1 (approx reciprocal -> loose tolerance)
    assert bool(jnp.allclose(jnp.sum(dec_attn, axis=-1), 1.0, atol=1e-2))
    assert bool(jnp.allclose(jnp.sum(dec_enc_attn, axis=-1), 1.0, atol=1e-2))

    print("KERNEL_OK")
</pallas_src>

<mosaic_0001>
module attributes {stable_mosaic.version = 11 : i64} {
  func.func @linear_bias_kernel(%arg0: i32, %arg1: i32, %arg2: i32, %arg3: memref<16x32xbf16, #tpu.memory_space<vmem>>, %arg4: memref<32x96xbf16, #tpu.memory_space<vmem>>, %arg5: memref<1x96xf32, #tpu.memory_space<vmem>>, %arg6: memref<16x96xbf16, #tpu.memory_space<vmem>>, %arg7: memref<16x96xf32, #tpu.memory_space<vmem>>) attributes {dimension_semantics = [#tpu.dimension_semantics<parallel>, #tpu.dimension_semantics<parallel>, #tpu.dimension_semantics<arbitrary>], iteration_bounds = array<i64: 1, 1, 1>, scalar_prefetch = 0 : i64, scratch_operands = 1 : i64, tpu.core_type = #tpu.core_type<tc>, window_params = [{transform_indices = @transform_0, window_bounds = array<i64: 16, 32>}, {transform_indices = @transform_1, window_bounds = array<i64: 32, 96>}, {transform_indices = @transform_2, window_bounds = array<i64: 1, 96>}, {transform_indices = @transform_3, window_bounds = array<i64: 16, 96>}]} {
    %c0_i32 = arith.constant 0 : i32
    %0 = arith.cmpi eq, %arg2, %c0_i32 : i32
    %1 = arith.extui %0 : i1 to i32
    %c0_i32_0 = arith.constant 0 : i32
    %2 = arith.cmpi ne, %1, %c0_i32_0 : i32
    scf.if %2 {
      %cst_10 = arith.constant 0.000000e+00 : f32
      %12 = vector.broadcast %cst_10 : f32 to vector<16x96xf32>
      %c0_11 = arith.constant 0 : index
      %c0_12 = arith.constant 0 : index
      %13 = vector.load %arg7[%c0_11, %c0_12] : memref<16x96xf32, #tpu.memory_space<vmem>>, vector<16x96xf32>
      tpu.vector_store %arg7[%c0_11, %c0_12], %12 {strides = array<i32>} : memref<16x96xf32, #tpu.memory_space<vmem>>, vector<16x96xf32>,
    } else {
    }
    %c0 = arith.constant 0 : index
    %c0_1 = arith.constant 0 : index
    %3 = vector.load %arg7[%c0, %c0_1] : memref<16x96xf32, #tpu.memory_space<vmem>>, vector<16x96xf32>
    %c0_2 = arith.constant 0 : index
    %c0_3 = arith.constant 0 : index
    %4 = vector.load %arg3[%c0_2, %c0_3] : memref<16x32xbf16, #tpu.memory_space<vmem>>, vector<16x32xbf16>
    %c0_4 = arith.constant 0 : index
    %c0_5 = arith.constant 0 : index
    %5 = vector.load %arg4[%c0_4, %c0_5] : memref<32x96xbf16, #tpu.memory_space<vmem>>, vector<32x96xbf16>
    %cst = arith.constant dense<0.000000e+00> : vector<16x96xf32>
    %6 = tpu.matmul %4, %5, %cst {dimension_numbers = #tpu.dot_dimension_numbers<[1], [0], [0], [1], [0, 0, 1, 1], [], []>} : vector<16x32xbf16>, vector<32x96xbf16>, vector<16x96xf32> -> vector<16x96xf32>
    %7 = arith.addf %3, %6 : vector<16x96xf32>
    %c0_6 = arith.constant 0 : index
    %c0_7 = arith.constant 0 : index
    %8 = vector.load %arg7[%c0_6, %c0_7] : memref<16x96xf32, #tpu.memory_space<vmem>>, vector<16x96xf32>
    tpu.vector_store %arg7[%c0_6, %c0_7], %7 {strides = array<i32>} : memref<16x96xf32, #tpu.memory_space<vmem>>, vector<16x96xf32>,
    %c0_i32_8 = arith.constant 0 : i32
    %9 = arith.cmpi eq, %arg2, %c0_i32_8 : i32
    %10 = arith.extui %9 : i1 to i32
    %c0_i32_9 = arith.constant 0 : i32
    %11 = arith.cmpi ne, %10, %c0_i32_9 : i32
    scf.if %11 {
      %c0_10 = arith.constant 0 : index
      %c0_11 = arith.constant 0 : index
      %12 = vector.load %arg7[%c0_10, %c0_11] : memref<16x96xf32, #tpu.memory_space<vmem>>, vector<16x96xf32>
      %c0_12 = arith.constant 0 : index
      %c0_13 = arith.constant 0 : index
      %13 = vector.load %arg5[%c0_12, %c0_13] : memref<1x96xf32, #tpu.memory_space<vmem>>, vector<1x96xf32>
      %14 = vector.broadcast %13 : vector<1x96xf32> to vector<16x96xf32>
      %15 = arith.addf %12, %14 : vector<16x96xf32>
      %16 = arith.truncf %15 : vector<16x96xf32> to vector<16x96xbf16>
      %c0_14 = arith.constant 0 : index
      %c0_15 = arith.constant 0 : index
      %17 = vector.load %arg6[%c0_14, %c0_15] : memref<16x96xbf16, #tpu.memory_space<vmem>>, vector<16x96xbf16>
      tpu.vector_store %arg6[%c0_14, %c0_15], %16 {strides = array<i32>} : memref<16x96xbf16, #tpu.memory_space<vmem>>, vector<16x96xbf16>,
    } else {
    }
    return
  }
  func.func @transform_0(%arg0: i32, %arg1: i32, %arg2: i32) -> (i32, i32) {
    %c0_i32 = arith.constant 0 : i32
    return %arg0, %arg2 : i32, i32
  }
  func.func @transform_1(%arg0: i32, %arg1: i32, %arg2: i32) -> (i32, i32) {
    %c0_i32 = arith.constant 0 : i32
    return %arg2, %arg1 : i32, i32
  }
  func.func @transform_2(%arg0: i32, %arg1: i32, %arg2: i32) -> (i32, i32) {
    %c0_i32 = arith.constant 0 : i32
    %c0_i32_0 = arith.constant 0 : i32
    return %c0_i32, %arg1 : i32, i32
  }
  func.func @transform_3(%arg0: i32, %arg1: i32, %arg2: i32) -> (i32, i32) {
    %c0_i32 = arith.constant 0 : i32
    return %arg0, %arg1 : i32, i32
  }
}

</mosaic_0001>

<bundles_post_ra>
// kernel: tpu_custom_call.1
= control target key start
LH: loop header
LB: loop body
LE: loop exit
PB: predicated region body
PF: predicated region fallthrough
CT: control target
= control target key end

     0   :  { %8 = vsyncpa [#allocation4], 0  ;;  %s350_s0 = inlined_call_operand.hbm [shape: bf16[16,32], index: 0, kind: input, shape index: {}]   ;;  %s351_s1 = inlined_call_operand.hbm [shape: bf16[32,96], index: 1, kind: input, shape index: {}]   ;;  %s352_s2 = inlined_call_operand.vmem [shape: f32[1,96], index: 2, kind: input, shape index: {}]   ;;  %s353_s3 = inlined_call_operand.hbm [shape: bf16[16,96], index: 3, kind: output, shape index: {}]  }
   0x1   :  { %9 = vsyncpa [#allocation7], 0 }
   0x2   :  { %10 = vsyncpa [#allocation5], 0  ;;  %s271_s12 = smov [#allocation3]   ;;  %s199_s16 = scalar_lea.hbm %s350_s0, 128 }
   0x3   :  { %s16_s13 = sshll.u32 %s271_s12, 4  ;;  %p200_p0 = scmp.ne.s32.totalorder %s350_s0, %s199_s16  ;;  %s17_s13 = int_to_ptr.vmem [resolvable:$true] %s16_s13 }
   0x4   :  { %p203_p1 = scmp.lt.u32.totalorder %s199_s16, %s350_s0 }
   0x6   :  { %p205_p2 = pnand %p203_p1, %p200_p0 }
   0x8   :  { %208 = shalt.err (!%p205_p2)
}
   0x9   :  { %s209_s21 = scalar_lea.vmem %s17_s13, 128  ;;  %p214_p4 = scmp.lt.s32.totalorder %s17_s13, %s17_s13 }
   0xa   :  { %p210_p3 = scmp.ne.s32.totalorder %s17_s13, %s209_s21  ;;  %p215_p5 = scmp.lt.s32.totalorder %s209_s21, %s209_s21 }
   0xc   :  { %p216_p6 = por %p215_p5, %p214_p4 }
   0xe   :  { %p217_p7 = pnand %p216_p6, %p210_p3 }
  0x10   :  { %220 = shalt.err (!%p217_p7)
}
  0x11   :  { %s272_s22 = smov 64   ;;  %s273_s23 = smov 4  }
  0x12   :  { %22 = dma.hbm_to_vmem [thread:$0]  %s350_s0, 128, %s17_s13, [#allocation4], %s272_s22, %s272_s22, %s273_s23  }
  0x13   :  { %s274_s26 = smov [#allocation6]   ;;  %s221_s30 = scalar_lea.hbm %s351_s1, 256 }
  0x14   :  { %s28_s27 = sshll.u32 %s274_s26, 4  ;;  %p222_p8 = scmp.ne.s32.totalorder %s351_s1, %s221_s30  ;;  %s29_s27 = int_to_ptr.vmem [resolvable:$true] %s28_s27 }
  0x15   :  { %p225_p9 = scmp.lt.u32.totalorder %s221_s30, %s351_s1 }
  0x17   :  { %p227_p10 = pnand %p225_p9, %p222_p8 }
  0x19   :  { %230 = shalt.err (!%p227_p10)
}
  0x1a   :  { %s231_s8 = scalar_lea.vmem %s29_s27, 256  ;;  %p236_p12 = scmp.lt.s32.totalorder %s29_s27, %s29_s27 }
  0x1b   :  { %p232_p11 = scmp.ne.s32.totalorder %s29_s27, %s231_s8  ;;  %p237_p13 = scmp.lt.s32.totalorder %s231_s8, %s231_s8 }
  0x1d   :  { %p238_p0 = por %p237_p13, %p236_p12 }
  0x1f   :  { %p239_p1 = pnand %p238_p0, %p232_p11 }
  0x21   :  { %242 = shalt.err (!%p239_p1)
}
  0x22   :  { %34 = dma.hbm_to_vmem [thread:$0]  %s351_s1, 256, %s29_s27, [#allocation7], %s272_s22, %s272_s22, %s273_s23  }
  0x23   :  { %265 = dma.done.wait [#allocation4], 128  }
  0x24   :  { %266 = vsyncadd [#allocation4], 4294967168 }
  0x25   :  { %267 = dma.done.wait [#allocation7], 256  }
  0x26   :  { %268 = vsyncadd [#allocation7], 4294967040  ;;  %vm48_vm0 = vcmask 785408   ;;  %v275_v0 = vmov 0.0   ;;  %vm276_vm1 = vmmov 0   ;;  %v196_v1 = vld [vmem:[#allocation6] sm:$0xff]  }
  0x27   :  { %49 = vst.msk [vmem:[#allocation2] sm:$0xff] %vm48_vm0, %v275_v0  ;;  %50 = vst.msk [vmem:[#allocation2 + $0x8] sm:$0xff] %vm48_vm0, %v275_v0  ;;  %181 = vmatprep.subr.bf16.mxu0 %v275_v0  ;;  %185 = vmatprep.mubr.msk.bf16.mxu0 %vm276_vm1, %v275_v0  ;;  %v197_v2 = vld [vmem:[#allocation6 + $0x8] sm:$0xff]   ;;  %v198_v3 = vld [vmem:[#allocation3] sm:$0xff]   ;;  %vm76_vm2 = vcmask 261120   ;;  %vm148_vm3 = vcmask 781312  }
  0x28   :  { %182 = vmatpush3.bf16.msra.mxu0 %v196_v1  ;;  %v173_v12 = vld [vmem:[%s352_s2] ss:$0 sm:$0xff]  ;;  %s277_s11 = smov [#allocation8]  }
  0x29   :  { %183 = vmatprep.subr.bf16.mxu0 %v275_v0  ;;  %s156_s12 = sshll.u32 %s277_s11, 4  ;;  %s157_s12 = int_to_ptr.vmem [resolvable:$true] %s156_s12 }
  0x2a   :  { %s243_s13 = scalar_lea.vmem %s157_s12, 128  ;;  %p248_p3 = scmp.lt.s32.totalorder %s157_s12, %s157_s12 }
  0x2b   :  { %p244_p2 = scmp.ne.s32.totalorder %s157_s12, %s243_s13  ;;  %p249_p4 = scmp.lt.s32.totalorder %s243_s13, %s243_s13 }
  0x2c   :  { %184 = vmatpush3.bf16.msra.mxu0 %v197_v2 }
  0x2d   :  { %p250_p5 = por %p249_p4, %p248_p3 }
  0x2e   :  { %v51_v4 = vld [vmem:[#allocation2] sm:$0xff]  ;;  %v52_v6 = vld [vmem:[#allocation2 + $0x8] sm:$0xff] }
  0x2f   :  { %186 = vmatmul.mubr.msk.bf16.vlgmr.msra.gmra.mrb[0].mxu0 %vm76_vm2, %v198_v3  ;;  %p251_p6 = pnand %p250_p5, %p244_p2 }
 0x102   :  { %v114_v5 = vpop.f32.mrb[0].mxu0 }
 0x103   :  { %v121_v7 = vadd.f32 %v114_v5, %v51_v4  ;;  %v187_v8 = vpop.f32.mrb[1].mxu0 }
 0x104   :  { %v117_v9 = vpop.f32.mrb[2].mxu0 }
 0x105   :  { %124 = vst.msk [vmem:[#allocation2] sm:$0xff] %vm48_vm0, %v121_v7  ;;  %v122_v10 = vadd.f32 %v117_v9, %v52_v6  ;;  %v188_v11 = vpop.f32.mrb[3].mxu0 }
 0x107   :  { %125 = vst.msk [vmem:[#allocation2 + $0x8] sm:$0xff] %vm48_vm0, %v122_v10 }
 0x10c   :  { %v129_v13 = vld [vmem:[#allocation2] sm:$0xff] }
 0x10d   :  { %v138_v14 = vadd.f32 %v173_v12, %v129_v13 }
 0x10e   :  { %v130_v15 = vld [vmem:[#allocation2 + $0x8] sm:$0xff] }
 0x10f   :  { %v139_v16 = vadd.f32 %v173_v12, %v130_v15  ;;  %v176_v17 = vpack.c.bf16 %v138_v14, %v138_v14 }
 0x111   :  { %v177_v18 = vpack.c.bf16 %v139_v16, %v139_v16  ;;  %149 = vst.msk [vmem:[#allocation8] sm:$0xf] %vm148_vm3, %v176_v17 }
 0x113   :  { %150 = vst.msk [vmem:[#allocation8 + $0x4] sm:$0xf] %vm148_vm3, %v177_v18 }
 0x114   :  { %254 = shalt.err (!%p251_p6)
}
 0x115   :  { %s255_s15 = scalar_lea.hbm %s353_s3, 128 }
 0x116   :  { %p256_p7 = scmp.ne.s32.totalorder %s353_s3, %s255_s15  ;;  %p259_p8 = scmp.lt.u32.totalorder %s255_s15, %s353_s3 }
 0x118   :  { %p261_p9 = pnand %p259_p8, %p256_p7 }
 0x11a   :  { %264 = shalt.err (!%p261_p9)
}
 0x11b   :  { %162 = dma.vmem_to_hbm [thread:$0]  %s157_s12, 128, %s353_s3, [#allocation5], %s272_s22, %s272_s22, %s273_s23  }
 0x11c   :  { %269 = dma.done.wait [#allocation5], 128  }
 0x11d   :  { %270 = vsyncadd [#allocation5], 4294967168 }
 0x11e   :  { %166 = vsyncpa [#allocation4], 1 }
 0x11f   :  { %167 = vsyncpa [#allocation7], 1 }
 0x120   :  { %168 = vsyncpa [#allocation5], 1 }

</bundles_post_ra>
